<compile_context>
chip_gen: v7x
topology: tpu7x:2x2x1
jax: 0.10.0
libtpu: 0.0.40
codegen_flags: <defaults>
</compile_context>

<pallas_src>
import functools

import jax
import jax.numpy as jnp
from jax import lax
from jax.experimental import pallas as pl
from jax.experimental.pallas import tpu as pltpu


def _round_up(a: int, b: int) -> int:
    return -(-a // b) * b


def _num_tensorcores() -> int:
    """Per-chip TensorCore count (2 only on multi-TC parts like v7x)."""
    try:
        info = pltpu.get_tpu_info()
    except Exception:
        return 1
    for attr in ("tensorcores_per_chip", "num_tensorcores", "tensorcore_count"):
        v = getattr(info, attr, None)
        if isinstance(v, int) and v >= 1:
            return min(v, 2)
    return 1


def _loss_reduce(x: jax.Array, target_tile_bytes: int) -> jax.Array:
    """mean(x**2) over all elements via a tiled Pallas streaming reduction."""
    n = x.size
    if n == 0:
        return jnp.float32(0.0)
    x_flat = x.reshape(-1)

    # Lane-aligned bulk (multiple of 128); the <128-element tail goes to XLA.
    bulk_n = (n // 128) * 128
    tail_sq = None
    if bulk_n < n:
        # TODO(synk): a manual-DMA tail inside the kernel would avoid this
        # (tiny, <128-element) XLA-side slice + sum for odd element counts.
        tail = x_flat[bulk_n:]
        tail_sq = jnp.sum(tail.astype(jnp.float32) ** 2)
    if bulk_n == 0:
        return tail_sq / jnp.float32(n)

    # Lane-dense slab: largest lane width in {512,256,128} dividing the bulk,
    # so the reshape is free (no host-side padding copy of the tensor).
    lanes = next(l for l in (512, 256, 128) if bulk_n % l == 0)
    rows = bulk_n // lanes

    itemsize = jnp.dtype(x.dtype).itemsize
    granule = max(8, 32 // itemsize)           # native sublane rows: 8/16/32

    x_bulk = x_flat if bulk_n == n else x_flat[:bulk_n]
    x2d = x_bulk.reshape(rows, lanes)
    if rows < granule:
        # Tiny operand (< granule*lanes elements): pad rows up to one native
        # block.  Bounded by ~64 KiB, so the copy is negligible.
        x2d = jnp.concatenate(
            [x2d, jnp.zeros((granule - rows, lanes), x2d.dtype)], axis=0)
        rows = granule

    # --- tile sizing: per-buffer cap ~2 MiB, aim for >= 4 tiles per core.
    num_tc = _num_tensorcores()
    min_tiles = 4 * num_tc
    max_tile_rows = max(
        granule, (target_tile_bytes // (lanes * itemsize)) // granule * granule)
    desired_rows = _round_up(-(-rows // min_tiles), granule)
    tile_rows = min(max_tile_rows, max(granule, desired_rows))

    chunk_rows = granule * 16                  # in-kernel accumulation chunk
    if tile_rows >= chunk_rows:
        tile_rows = (tile_rows // chunk_rows) * chunk_rows
    else:
        chunk_rows = tile_rows
    n_chunks = tile_rows // chunk_rows

    num_tiles = -(-rows // tile_rows)
    num_par = min(num_tc, num_tiles)           # 2 only on multi-TC chips
    tiles_per_par = -(-num_tiles // num_par)
    covered_rows = num_par * tiles_per_par * tile_rows
    needs_mask = covered_rows > rows
    first_masked = rows // tile_rows           # first block extending past rows
    last_blk = num_tiles - 1
    acc_rows = 8                               # f32 vreg sublane rows

    def kernel(x_ref, acc_ref):
        t = pl.program_id(1)
        blk = pl.program_id(0) * tiles_per_par + t

        @pl.when(t == 0)
        def _():
            acc_ref[...] = jnp.zeros_like(acc_ref)

        def accumulate(masked):
            if masked:
                row_iota = lax.broadcasted_iota(jnp.int32, (chunk_rows, lanes), 0)
                tile_row0 = blk * tile_rows
            for c in range(n_chunks):          # short, fully unrolled
                r0 = c * chunk_rows
                xv = x_ref[pl.ds(r0, chunk_rows), :].astype(jnp.float32)
                if masked:
                    gr = tile_row0 + r0 + row_iota
                    xv = jnp.where(gr < rows, xv, 0.0)
                sq = xv * xv
                # Splits only the leading axis (free reshape); the axis-0 sum
                # is a chain of vreg VALU adds, no per-tile XLU reduce.
                acc_ref[...] += jnp.sum(
                    sq.reshape(chunk_rows // acc_rows, acc_rows, lanes), axis=0)

        if needs_mask:
            if first_masked > 0:
                @pl.when(blk < first_masked)
                def _():
                    accumulate(False)

            @pl.when(blk >= first_masked)
            def _():
                accumulate(True)
        else:
            accumulate(False)

    partials = pl.pallas_call(
        kernel,
        out_shape=jax.ShapeDtypeStruct((num_par * acc_rows, lanes), jnp.float32),
        grid_spec=pltpu.PrefetchScalarGridSpec(
            num_scalar_prefetch=0,
            grid=(num_par, tiles_per_par),
            in_specs=[pl.BlockSpec(
                (tile_rows, lanes),
                # Clamp so a (rare) over-covering grid point re-reads the last
                # real block; its contribution is fully masked in the kernel.
                lambda p, t: (jnp.minimum(p * tiles_per_par + t, last_blk), 0))],
            out_specs=pl.BlockSpec((acc_rows, lanes), lambda p, t: (p, 0)),
        ),
        compiler_params=pltpu.CompilerParams(
            dimension_semantics=("parallel", "arbitrary")),
        # <=2 MiB double-buffered tiles fit the default scoped VMEM budget on
        # v5e / v6e / v7x, so no hand-set vmem_limit_bytes.
    )(x2d)

    total = jnp.sum(partials)
    if tail_sq is not None:
        total = total + tail_sq
    return total / jnp.float32(n)


@functools.partial(jax.jit, static_argnums=(1,))
def _loss_reduce_jit(x, target_tile_bytes):
    return _loss_reduce(x, target_tile_bytes)


def pallas_loss_reduce(x: jax.Array, *, target_tile_bytes: int = 2 << 20) -> jax.Array:
    return _loss_reduce_jit(x, int(target_tile_bytes))


class LossTerm:
    """JAX mirror of the abstract PyTorch LossTerm base class."""

    required_tensors = []

    def __init__(self, cfg=None, params=None, net=None):
        # Base class allocates no parameters (matches nn.Module __init__).
        pass

    def forward(self, net, cfg, extra):
        raise NotImplementedError()

    # Helper concrete subclasses can use as their kernelized hot path.
    @staticmethod
    def reduce_loss(x: jax.Array) -> jax.Array:
        return pallas_loss_reduce(x)


if __name__ == "__main__":
    key = jax.random.PRNGKey(0)
    # Small NCHW example input consistent with a typical loss-term operand.
    x = jax.random.normal(key, (2, 4, 16, 16), dtype=jnp.float32)

    term = LossTerm(cfg=None, params=None, net=None)

    # The base-class forward is abstract — verify it still raises, as in torch.
    try:
        term.forward(net=None, cfg=None, extra=None)
        raise RuntimeError("forward() should have raised NotImplementedError")
    except NotImplementedError:
        pass

    # 1) Small aligned tensor (exercises the tiny-row pad + single-tile path).
    loss = term.reduce_loss(x)
    jax.block_until_ready(loss)
    ref = jnp.mean(x.astype(jnp.float32) ** 2)
    assert jnp.allclose(loss, ref, rtol=1e-5, atol=1e-6), (loss, ref)

    # 2) Misaligned element count (2*3*33*65 = 12870): exercises the XLA tail,
    #    multi-tile accumulation and in-kernel boundary-row masking.
    x2 = jax.random.normal(jax.random.PRNGKey(1), (2, 3, 33, 65), dtype=jnp.float32)
    loss2 = pallas_loss_reduce(x2)
    jax.block_until_ready(loss2)
    ref2 = jnp.mean(x2.astype(jnp.float32) ** 2)
    assert jnp.allclose(loss2, ref2, rtol=1e-5, atol=1e-6), (loss2, ref2)

    # 3) bf16 operand: exercises the dtype-aware (16-row) tiling and the
    #    group-wise f32 accumulation path.
    x3 = jax.random.normal(jax.random.PRNGKey(2), (4, 8, 32, 32), dtype=jnp.bfloat16)
    loss3 = pallas_loss_reduce(x3)
    jax.block_until_ready(loss3)
    ref3 = jnp.mean(x3.astype(jnp.float32) ** 2)
    assert jnp.allclose(loss3, ref3, rtol=1e-4, atol=1e-5), (loss3, ref3)

    print("KERNEL_OK")
</pallas_src>

<mosaic_0001>
module attributes {stable_mosaic.version = 11 : i64} {
  func.func @kernel(%arg0: i32, %arg1: i32, %arg2: memref<8x512xf32, #tpu.memory_space<vmem>>, %arg3: memref<8x512xf32, #tpu.memory_space<vmem>>) attributes {dimension_semantics = [#tpu.dimension_semantics<parallel>, #tpu.dimension_semantics<arbitrary>], iteration_bounds = array<i64: 1, 1>, scalar_prefetch = 0 : i64, scratch_operands = 0 : i64, tpu.core_type = #tpu.core_type<tc>, window_params = [{transform_indices = @transform_0, window_bounds = array<i64: 8, 512>}, {transform_indices = @transform_1, window_bounds = array<i64: 8, 512>}]} {
    %c0_i32 = arith.constant 0 : i32
    %0 = arith.cmpi eq, %arg1, %c0_i32 : i32
    %1 = arith.extui %0 : i1 to i32
    %c0_i32_0 = arith.constant 0 : i32
    %2 = arith.cmpi ne, %1, %c0_i32_0 : i32
    scf.if %2 {
      %cst_6 = arith.constant 0.000000e+00 : f32
      %10 = vector.broadcast %cst_6 : f32 to vector<8x512xf32>
      %c0_7 = arith.constant 0 : index
      %c0_8 = arith.constant 0 : index
      %11 = vector.load %arg3[%c0_7, %c0_8] : memref<8x512xf32, #tpu.memory_space<vmem>>, vector<8x512xf32>
      tpu.vector_store %arg3[%c0_7, %c0_8], %10 {strides = array<i32>} : memref<8x512xf32, #tpu.memory_space<vmem>>, vector<8x512xf32>,
    } else {
    }
    %c0 = arith.constant 0 : index
    %c0_1 = arith.constant 0 : index
    %3 = vector.load %arg2[%c0, %c0_1] : memref<8x512xf32, #tpu.memory_space<vmem>>, vector<8x512xf32>
    %4 = arith.mulf %3, %3 : vector<8x512xf32>
    %c0_2 = arith.constant 0 : index
    %c0_3 = arith.constant 0 : index
    %5 = vector.load %arg3[%c0_2, %c0_3] : memref<8x512xf32, #tpu.memory_space<vmem>>, vector<8x512xf32>
    %6 = vector.shape_cast %4 : vector<8x512xf32> to vector<1x8x512xf32>
    %cst = arith.constant dense<0.000000e+00> : vector<8x512xf32>
    %7 = vector.multi_reduction <add>, %6, %cst [0] : vector<1x8x512xf32> to vector<8x512xf32>
    %8 = arith.addf %5, %7 : vector<8x512xf32>
    %c0_4 = arith.constant 0 : index
    %c0_5 = arith.constant 0 : index
    %9 = vector.load %arg3[%c0_4, %c0_5] : memref<8x512xf32, #tpu.memory_space<vmem>>, vector<8x512xf32>
    tpu.vector_store %arg3[%c0_4, %c0_5], %8 {strides = array<i32>} : memref<8x512xf32, #tpu.memory_space<vmem>>, vector<8x512xf32>,
    return
  }
  func.func @transform_0(%arg0: i32, %arg1: i32) -> (i32, i32) {
    %c1_i32 = arith.constant 1 : i32
    %0 = arith.muli %arg0, %c1_i32 : i32
    %1 = arith.addi %0, %arg1 : i32
    %c0_i32 = arith.constant 0 : i32
    %2 = arith.minsi %1, %c0_i32 : i32
    %c0_i32_0 = arith.constant 0 : i32
    %c0_i32_1 = arith.constant 0 : i32
    return %2, %c0_i32_0 : i32, i32
  }
  func.func @transform_1(%arg0: i32, %arg1: i32) -> (i32, i32) {
    %c0_i32 = arith.constant 0 : i32
    %c0_i32_0 = arith.constant 0 : i32
    return %arg0, %c0_i32 : i32, i32
  }
}

</mosaic_0001>

<bundles_post_ra>
// kernel: _loss_reduce_jit.1
= control target key start
LH: loop header
LB: loop body
LE: loop exit
PB: predicated region body
PF: predicated region fallthrough
CT: control target
= control target key end

     0   :  { %s115_s0 = inlined_call_operand.vmem [shape: f32[8,512], index: 0, kind: input, shape index: {}]   ;;  %s116_s1 = inlined_call_operand.vmem [shape: f32[8,512], index: 1, kind: output, shape index: {}]  }
   0x1   :  { %v46_v0 = vld [vmem:[%s115_s0] sm:$0xff]  ;;  %v47_v1 = vld [vmem:[%s115_s0 + $0x8] sm:$0xff]  ;;  %v48_v2 = vld [vmem:[%s115_s0 + $0x10] sm:$0xff] }
   0x2   :  { %v50_v3 = vmul.f32 %v46_v0, %v46_v0  ;;  %v51_v4 = vmul.f32 %v47_v1, %v47_v1  ;;  %v52_v5 = vmul.f32 %v48_v2, %v48_v2  ;;  %v49_v6 = vld [vmem:[%s115_s0 + $0x18] sm:$0xff] }
   0x3   :  { %v53_v7 = vmul.f32 %v49_v6, %v49_v6 }
   0x4   :  { %66 = vst [vmem:[%s116_s1] sm:$0xff] %v50_v3  ;;  %67 = vst [vmem:[%s116_s1 + $0x8] sm:$0xff] %v51_v4 }
   0x5   :  { %68 = vst [vmem:[%s116_s1 + $0x10] sm:$0xff] %v52_v5  ;;  %69 = vst [vmem:[%s116_s1 + $0x18] sm:$0xff] %v53_v7 }

</bundles_post_ra>
